<compile_context>
chip_gen: v6e
topology: v6e:2x2x1
jax: 0.10.0
libtpu: 0.0.40
codegen_flags: <defaults>
</compile_context>

<pallas_src>
import jax
import jax.numpy as jnp
from jax import lax
from jax.experimental import pallas as pl
from jax.experimental.pallas import tpu as pltpu

BATCHNORM_EPS = 1e-5        # model_config.HEAD.BATCHNORM_EPS
BATCHNORM_MOMENTUM = 0.1    # model_config.HEAD.BATCHNORM_MOMENTUM (only affects
                            # running-stat updates, which do not change the
                            # training-mode forward output)


def _batchnorm1d_kernel(x_ref, gamma_ref, beta_ref, o_ref):
    # x_ref: (N, TC) block, channels on lanes. Reduce over axis 0 (sublanes).
    n = x_ref.shape[0]
    inv_n = 1.0 / n

    # Pass 1: per-channel mean, accumulated in f32.
    mean = jnp.sum(x_ref[...].astype(jnp.float32), axis=0, keepdims=True) * inv_n

    # Pass 2: re-read x (VMEM re-load is cheap and hidden under HBM DMA) for a
    # numerically stable centered variance; avoids keeping a full-size f32
    # temporary live across passes.
    centered = x_ref[...].astype(jnp.float32) - mean
    var = jnp.sum(centered * centered, axis=0, keepdims=True) * inv_n  # biased

    inv_std = lax.rsqrt(var + BATCHNORM_EPS)          # (1, TC), EUP
    scale = gamma_ref[...] * inv_std                  # (1, TC) f32
    bias = beta_ref[...] - mean * scale               # (1, TC) f32

    # Pass 3: single FMA per element. Keep bf16 inputs in bf16 on the
    # elementwise path (native on v6e/v7x); f32 path otherwise (incl. v5e).
    if x_ref.dtype == jnp.bfloat16:
        y = x_ref[...] * scale.astype(jnp.bfloat16) + bias.astype(jnp.bfloat16)
    else:
        y = x_ref[...].astype(jnp.float32) * scale + bias
    o_ref[...] = y.astype(o_ref.dtype)


def _round_up(x, m):
    return ((x + m - 1) // m) * m


def _choose_channel_tile(n, c_pad128, itemsize):
    """Pick a lane tile (multiple of 128) such that:
      * the double-buffered working set (2 in bufs + 2 out bufs) of
        4 * N * TC * itemsize bytes stays well under the scoped-VMEM budget on
        every generation (conservative for v7x's 64 MiB physical VMEM), and
      * TC divides the 128-padded channel count, so no extra lane padding
        (and hence no extra HBM traffic) is introduced by tiling.
    """
    budget = 12 << 20  # bytes for 4 * N * TC * itemsize
    tc = min(2048, c_pad128)
    while tc > 128 and 4 * n * tc * itemsize > budget:
        tc = max(128, _round_up(tc // 2, 128))
    while c_pad128 % tc != 0:   # terminates: 128 always divides c_pad128
        tc -= 128
    return tc


def batchnorm_head(batch, gamma, beta):
    """Forward pass of the Batchnorm head.

    Args:
      batch: 2D (N, C) array, or 4D (N, C, 1, 1) array, or a 1-element list.
      gamma, beta: (C,) affine parameters of BatchNorm1d.
    Returns:
      2D (N, C) array.
    """
    if isinstance(batch, (list, tuple)):
        assert len(batch) == 1, (
            "Batchnorm input should be either a tensor (2D, 4D) or list containing 1 tensor."
        )
        batch = batch[0]
    if batch.ndim > 2:
        assert all(d == 1 for d in batch.shape[2:]), (
            f"Batchnorm expected 2D input tensor or 4D tensor of shape NxCx1x1. got: {batch.shape}"
        )
        batch = batch.reshape((batch.shape[0], batch.shape[1]))

    n, c = batch.shape
    itemsize = jnp.dtype(batch.dtype).itemsize

    # Lane-dense channel padding (multiple of 128) + per-generation-safe tile
    # that divides the padded channel count.
    c_pad = _round_up(c, 128)
    tc = _choose_channel_tile(n, c_pad, itemsize)

    gamma2d = gamma.reshape(1, c).astype(jnp.float32)
    beta2d = beta.reshape(1, c).astype(jnp.float32)
    if c_pad != c:
        batch = jnp.pad(batch, ((0, 0), (0, c_pad - c)))
        gamma2d = jnp.pad(gamma2d, ((0, 0), (0, c_pad - c)))
        beta2d = jnp.pad(beta2d, ((0, 0), (0, c_pad - c)))

    grid = (pl.cdiv(c_pad, tc),)

    out = pl.pallas_call(
        _batchnorm1d_kernel,
        out_shape=jax.ShapeDtypeStruct((n, c_pad), batch.dtype),
        grid=grid,
        in_specs=[
            pl.BlockSpec((n, tc), lambda j: (0, j)),
            pl.BlockSpec((1, tc), lambda j: (0, j)),
            pl.BlockSpec((1, tc), lambda j: (0, j)),
        ],
        out_specs=pl.BlockSpec((n, tc), lambda j: (0, j)),
        compiler_params=pltpu.CompilerParams(
            dimension_semantics=("parallel",),
        ),
    )(batch, gamma2d, beta2d)

    if c_pad != c:
        out = out[:, :c]
    return out


if __name__ == "__main__":
    key = jax.random.PRNGKey(0)
    kx, kg, kb = jax.random.split(key, 3)

    N, C = 8, 128
    # Module forward accepts N x C x 1 x 1 (e.g. output of a global pool).
    x = jax.random.normal(kx, (N, C, 1, 1), dtype=jnp.float32) * 2.0 + 0.5
    # BatchNorm1d defaults are gamma=1, beta=0; use small random affine to
    # exercise broadcasting.
    gamma = 1.0 + 0.1 * jax.random.normal(kg, (C,), dtype=jnp.float32)
    beta = 0.1 * jax.random.normal(kb, (C,), dtype=jnp.float32)

    out = batchnorm_head([x], gamma, beta)
    out = jax.block_until_ready(out)

    # Cross-check against a pure-JAX reference of training-mode BatchNorm1d.
    x2d = x.reshape(N, C)
    mean = jnp.mean(x2d, axis=0, keepdims=True)
    var = jnp.mean((x2d - mean) ** 2, axis=0, keepdims=True)
    ref = (x2d - mean) / jnp.sqrt(var + BATCHNORM_EPS) * gamma[None, :] + beta[None, :]
    assert out.shape == (N, C)
    assert jnp.max(jnp.abs(out - ref)) < 1e-4

    print("KERNEL_OK")
</pallas_src>

<mosaic_0001>
module attributes {stable_mosaic.version = 11 : i64} {
  func.func @_batchnorm1d_kernel(%arg0: i32, %arg1: memref<8x128xf32, #tpu.memory_space<vmem>>, %arg2: memref<1x128xf32, #tpu.memory_space<vmem>>, %arg3: memref<1x128xf32, #tpu.memory_space<vmem>>, %arg4: memref<8x128xf32, #tpu.memory_space<vmem>>) attributes {dimension_semantics = [#tpu.dimension_semantics<parallel>], iteration_bounds = array<i64: 1>, scalar_prefetch = 0 : i64, scratch_operands = 0 : i64, tpu.core_type = #tpu.core_type<tc>, window_params = [{transform_indices = @transform_0, window_bounds = array<i64: 8, 128>}, {transform_indices = @transform_1, window_bounds = array<i64: 1, 128>}, {transform_indices = @transform_2, window_bounds = array<i64: 1, 128>}, {transform_indices = @transform_3, window_bounds = array<i64: 8, 128>}]} {
    %c0 = arith.constant 0 : index
    %c0_0 = arith.constant 0 : index
    %0 = vector.load %arg1[%c0, %c0_0] : memref<8x128xf32, #tpu.memory_space<vmem>>, vector<8x128xf32>
    %cst = arith.constant dense<0.000000e+00> : vector<128xf32>
    %1 = vector.multi_reduction <add>, %0, %cst [0] : vector<8x128xf32> to vector<128xf32>
    %2 = vector.shape_cast %1 : vector<128xf32> to vector<1x128xf32>
    %cst_1 = arith.constant 1.250000e-01 : f32
    %3 = vector.broadcast %cst_1 : f32 to vector<1x128xf32>
    %4 = arith.mulf %2, %3 : vector<1x128xf32>
    %c0_2 = arith.constant 0 : index
    %c0_3 = arith.constant 0 : index
    %5 = vector.load %arg1[%c0_2, %c0_3] : memref<8x128xf32, #tpu.memory_space<vmem>>, vector<8x128xf32>
    %6 = vector.broadcast %4 : vector<1x128xf32> to vector<8x128xf32>
    %7 = arith.subf %5, %6 : vector<8x128xf32>
    %8 = arith.mulf %7, %7 : vector<8x128xf32>
    %cst_4 = arith.constant dense<0.000000e+00> : vector<128xf32>
    %9 = vector.multi_reduction <add>, %8, %cst_4 [0] : vector<8x128xf32> to vector<128xf32>
    %10 = vector.shape_cast %9 : vector<128xf32> to vector<1x128xf32>
    %cst_5 = arith.constant 1.250000e-01 : f32
    %11 = vector.broadcast %cst_5 : f32 to vector<1x128xf32>
    %12 = arith.mulf %10, %11 : vector<1x128xf32>
    %cst_6 = arith.constant 9.99999974E-6 : f32
    %13 = vector.broadcast %cst_6 : f32 to vector<1x128xf32>
    %14 = arith.addf %12, %13 : vector<1x128xf32>
    %15 = math.rsqrt %14 : vector<1x128xf32>
    %c0_7 = arith.constant 0 : index
    %c0_8 = arith.constant 0 : index
    %16 = vector.load %arg2[%c0_7, %c0_8] : memref<1x128xf32, #tpu.memory_space<vmem>>, vector<1x128xf32>
    %17 = arith.mulf %16, %15 : vector<1x128xf32>
    %c0_9 = arith.constant 0 : index
    %c0_10 = arith.constant 0 : index
    %18 = vector.load %arg3[%c0_9, %c0_10] : memref<1x128xf32, #tpu.memory_space<vmem>>, vector<1x128xf32>
    %19 = arith.mulf %4, %17 : vector<1x128xf32>
    %20 = arith.subf %18, %19 : vector<1x128xf32>
    %c0_11 = arith.constant 0 : index
    %c0_12 = arith.constant 0 : index
    %21 = vector.load %arg1[%c0_11, %c0_12] : memref<8x128xf32, #tpu.memory_space<vmem>>, vector<8x128xf32>
    %22 = vector.broadcast %17 : vector<1x128xf32> to vector<8x128xf32>
    %23 = arith.mulf %21, %22 : vector<8x128xf32>
    %24 = vector.broadcast %20 : vector<1x128xf32> to vector<8x128xf32>
    %25 = arith.addf %23, %24 : vector<8x128xf32>
    %c0_13 = arith.constant 0 : index
    %c0_14 = arith.constant 0 : index
    %26 = vector.load %arg4[%c0_13, %c0_14] : memref<8x128xf32, #tpu.memory_space<vmem>>, vector<8x128xf32>
    tpu.vector_store %arg4[%c0_13, %c0_14], %25 {strides = array<i32>} : memref<8x128xf32, #tpu.memory_space<vmem>>, vector<8x128xf32>,
    return
  }
  func.func @transform_0(%arg0: i32) -> (i32, i32) {
    %c0_i32 = arith.constant 0 : i32
    %c0_i32_0 = arith.constant 0 : i32
    return %c0_i32, %arg0 : i32, i32
  }
  func.func @transform_1(%arg0: i32) -> (i32, i32) {
    %c0_i32 = arith.constant 0 : i32
    %c0_i32_0 = arith.constant 0 : i32
    return %c0_i32, %arg0 : i32, i32
  }
  func.func @transform_2(%arg0: i32) -> (i32, i32) {
    %c0_i32 = arith.constant 0 : i32
    %c0_i32_0 = arith.constant 0 : i32
    return %c0_i32, %arg0 : i32, i32
  }
  func.func @transform_3(%arg0: i32) -> (i32, i32) {
    %c0_i32 = arith.constant 0 : i32
    %c0_i32_0 = arith.constant 0 : i32
    return %c0_i32, %arg0 : i32, i32
  }
}

</mosaic_0001>

<bundles_post_ra>
// kernel: tpu_custom_call.1
= control target key start
LH: loop header
LB: loop body
LE: loop exit
PB: predicated region body
PF: predicated region fallthrough
CT: control target
= control target key end

     0   :  { %8 = vsyncpa [#allocation3], 0  ;;  %s163_s0 = inlined_call_operand.hbm [shape: f32[8,128], index: 0, kind: input, shape index: {}]   ;;  %s164_s1 = inlined_call_operand.vmem [shape: f32[1,128], index: 1, kind: input, shape index: {}]   ;;  %s165_s2 = inlined_call_operand.vmem [shape: f32[1,128], index: 2, kind: input, shape index: {}]   ;;  %s166_s3 = inlined_call_operand.hbm [shape: f32[8,128], index: 3, kind: output, shape index: {}]  }
   0x1   :  { %9 = vsyncpa [#allocation4], 0  ;;  %s129_s12 = smov [#allocation2]  }
   0x2   :  { %s16_s13 = sshll.u32 %s129_s12, 4  ;;  %s17_s13 = int_to_ptr.vmem [resolvable:$true] %s16_s13 }
   0x3   :  { %s93_s14 = scalar_lea.vmem %s17_s13, 128  ;;  %p98_p1 = scmp.lt.s32.totalorder %s17_s13, %s17_s13 }
   0x4   :  { %p94_p0 = scmp.ne.s32.totalorder %s17_s13, %s93_s14  ;;  %p99_p2 = scmp.lt.s32.totalorder %s93_s14, %s93_s14 }
   0x6   :  { %p100_p3 = por %p99_p2, %p98_p1 }
   0x8   :  { %p101_p4 = pnand %p100_p3, %p94_p0 }
   0xa   :  { %104 = shalt.err (!%p101_p4)
}
   0xb   :  { %19 = dma.hbm_to_vmem [thread:$0]  %s163_s0, 128, %s17_s13, [#allocation3]  }
   0xc   :  { %125 = dma.done.wait [#allocation3], 128  }
   0xd   :  { %126 = vsyncadd [#allocation3], 4294967168  ;;  %v27_v0 = vld [vmem:[#allocation2] sm:$0xff]  ;;  %v52_v18 = vlaneseq  ;;  %s130_s20 = smov [#allocation5]  }
   0xe   :  { %v28_v1 = vrot.slane %v27_v0, 4  ;;  %v46_v20 = vld [vmem:[%s164_s1] sm:$0x1]  ;;  %s72_s21 = sshll.u32 %s130_s20, 4  ;;  %s73_s21 = int_to_ptr.vmem [resolvable:$true] %s72_s21 }
   0xf   :  { %v53_v19 = vshrl.u32 %v52_v18, 7  ;;  %v48_v24 = vld [vmem:[%s165_s2] sm:$0x1]  ;;  %s105_s22 = scalar_lea.vmem %s73_s21, 128  ;;  %p110_p6 = scmp.lt.s32.totalorder %s73_s21, %s73_s21 }
  0x10   :  { %v29_v2 = vadd.f32 %v28_v1, %v27_v0  ;;  %p106_p5 = scmp.ne.s32.totalorder %s73_s21, %s105_s22  ;;  %p111_p7 = scmp.lt.s32.totalorder %s105_s22, %s105_s22 }
  0x11   :  { %v54_v21 = vsub.s32 0, %v53_v19 }
  0x12   :  { %v30_v3 = vrot.slane %v29_v2, 2  ;;  %p112_p8 = por %p111_p7, %p110_p6 }
  0x14   :  { %v31_v4 = vadd.f32 %v30_v3, %v29_v2  ;;  %p113_p9 = pnand %p112_p8, %p106_p5 }
  0x16   :  { %v32_v5 = vrot.slane %v31_v4, 1 }
  0x18   :  { %v33_v6 = vadd.f32 %v32_v5, %v31_v4 }
  0x1a   :  { %v34_v7 = vmul.f32 0.125, %v33_v6 }
  0x1c   :  { %v35_v8 = vsub.f32 %v27_v0, %v34_v7 }
  0x1e   :  { %v36_v9 = vmul.f32 %v35_v8, %v35_v8 }
  0x20   :  { %v37_v10 = vrot.slane %v36_v9, 4 }
  0x22   :  { %v38_v11 = vadd.f32 %v37_v10, %v36_v9 }
  0x24   :  { %v39_v12 = vrot.slane %v38_v11, 2 }
  0x26   :  { %v40_v13 = vadd.f32 %v39_v12, %v38_v11 }
  0x28   :  { %v41_v14 = vrot.slane %v40_v13, 1 }
  0x2a   :  { %v42_v15 = vadd.f32 %v41_v14, %v40_v13 }
  0x2c   :  { %v43_v16 = vmul.f32 0.125, %v42_v15 }
  0x2e   :  { %v44_v17 = vadd.f32 1e-05, %v43_v16 }
  0x30   :  { %83 = vrsqrt.f32 %v44_v17 }
  0x3d   :  { %v84_v22 = vpop.eup %83 }
  0x3e   :  { %v47_v23 = vmul.f32 %v84_v22, %v46_v20 }
  0x40   :  { %v49_v25 = vmul.f32 %v47_v23, %v34_v7  ;;  %v55_v26 = vrot.slane %v47_v23, %v54_v21 }
  0x42   :  { %v50_v27 = vsub.f32 %v48_v24, %v49_v25  ;;  %v57_v28 = vmul.f32 %v55_v26, %v27_v0 }
  0x44   :  { %v62_v29 = vrot.slane %v50_v27, %v54_v21 }
  0x46   :  { %v64_v30 = vadd.f32 %v62_v29, %v57_v28 }
  0x48   :  { %65 = vst [vmem:[#allocation5] sm:$0xff] %v64_v30 }
  0x49   :  { %116 = shalt.err (!%p113_p9)
}
  0x4a   :  { %75 = dma.vmem_to_hbm [thread:$0]  %s73_s21, 128, %s166_s3, [#allocation4]  }
  0x4b   :  { %127 = dma.done.wait [#allocation4], 128  }
  0x4c   :  { %128 = vsyncadd [#allocation4], 4294967168 }
  0x4d   :  { %79 = vsyncpa [#allocation3], 1 }
  0x4e   :  { %80 = vsyncpa [#allocation4], 1 }

</bundles_post_ra>
